<compile_context>
chip_gen: v6e
topology: v6e:2x2x1
jax: 0.10.0
libtpu: 0.0.40
codegen_flags: <defaults>
</compile_context>

<pallas_src>
import functools
import math
from typing import NamedTuple

import jax
import jax.numpy as jnp
from jax.experimental import pallas as pl
from jax.experimental.pallas import tpu as pltpu


def _round_up(x, m):
    return (x + m - 1) // m * m


def _vmem_capacity_bytes():
    """Per-core VMEM capacity; conservative 64 MiB (v7x) default if unknown."""
    default = 64 << 20
    try:
        info = pltpu.get_tpu_info()
        cap = int(getattr(info, "vmem_capacity_bytes", default))
        return cap if cap > 0 else default
    except Exception:
        return default


class NeuronParams(NamedTuple):
    w: jax.Array        # (d_in_pad, d_out_pad) bf16, transposed + zero-padded
    b: jax.Array        # (1, d_out_pad) f32, zero-padded
    d_in: int
    d_out: int
    tn: int             # D_out tile width (== d_out_pad when weight is resident)
    vmem_cap: int


def prepare_neuron_params(weight, bias):
    """One-time parameter prep (hoisted out of the per-call path).

    Transposes the PyTorch-layout weight (D_out, D_in) to (D_in, D_out),
    zero-pads both dims lane-dense, and casts the weight to bf16.
    Also decides the D_out tile width tn based on the VMEM budget.
    """
    D_out, D_in = weight.shape
    d_in_pad = _round_up(D_in, 128)
    d_out_128 = _round_up(D_out, 128)

    cap = _vmem_capacity_bytes()
    budget = int(0.60 * cap)

    w_full_bytes = d_in_pad * d_out_128 * 2  # bf16
    if w_full_bytes <= budget // 2:
        tn = d_out_128                       # whole weight resident (single-buffered)
    else:
        # Stream the bf16 weight over D_out: a double-buffered (d_in_pad, tn)
        # tile must fit in half of the budget.
        tn = (budget // 2) // (2 * d_in_pad * 2)
        tn = min(d_out_128, max(128, (tn // 128) * 128))
    d_out_pad = _round_up(d_out_128, tn)

    w_p = jnp.pad(weight.astype(jnp.float32).T,
                  ((0, d_in_pad - D_in), (0, d_out_pad - D_out))).astype(jnp.bfloat16)
    b_p = jnp.pad(bias.astype(jnp.float32).reshape(1, D_out),
                  ((0, 0), (0, d_out_pad - D_out)))
    return NeuronParams(w=w_p, b=b_p, d_in=D_in, d_out=D_out, tn=tn, vmem_cap=cap)


def _neuron_kernel(x_ref, w_ref, b_ref, y_ref, psum_ref, *,
                   inv_d_in, rows_in_last, needs_mask, nb):
    """One (batch, D_out) tile: RMS-norm -> bf16 matmul + bias -> ReLU + partial sums."""
    i = pl.program_id(0)
    tb = x_ref.shape[0]
    tn = y_ref.shape[1]

    x = x_ref[...]                                              # (tb, d_in_pad) f32
    # mean(x**2) over the *true* feature count (zero-padded lanes contribute 0).
    ms = jnp.sum(x * x, axis=-1, keepdims=True) * inv_d_in      # (tb, 1) f32
    # Exact reciprocal (Newton-refined); cost is negligible at (tb, 1) elements.
    inv = pl.reciprocal(jnp.sqrt(ms) + 1e-8, approx=False)
    x_dir = (x * inv).astype(w_ref.dtype)                       # bf16 MXU operand

    # MXU matmul: bf16 operands, f32 accumulation; bias add in f32.
    lin = jnp.dot(x_dir, w_ref[...],
                  preferred_element_type=jnp.float32) + b_ref[...]   # (tb, tn) f32

    # ReLU output (f32, matches module semantics).
    y_ref[...] = jnp.maximum(lin, 0.0)

    # Partial column-sums of the pre-activation for the mean.  Padded D_out
    # columns are exactly 0 (zero weights & bias).  Lane-dense unmasked
    # (8, tn) store; only sublane 0 is read back by the wrapper.
    def _slab(v):
        cs = jnp.sum(v, axis=0, keepdims=True)                  # (1, tn)
        return jnp.broadcast_to(cs, (8, tn))

    if needs_mask:
        # Only the last batch tile contains padded rows; mask there only.
        @pl.when(i == nb - 1)
        def _():
            valid = jax.lax.broadcasted_iota(jnp.int32, (tb, 1), 0) < rows_in_last
            psum_ref[...] = _slab(jnp.where(valid, lin, 0.0))

        @pl.when(i != nb - 1)
        def _():
            psum_ref[...] = _slab(lin)
    else:
        psum_ref[...] = _slab(lin)


def _build_call(kernel, nb, nn, tb, tn, d_in_pad, d_out_pad, b_pad,
                vmem_limit, single_buffer):
    # Resident (constant-index) weight/bias: single buffer saves the largest
    # VMEM chunk.  When the weight is streamed over D_out, keep default (2x).
    res_kwargs = dict(pipeline_mode=pl.Buffered(1)) if single_buffer else {}
    in_specs = (
        pl.BlockSpec((tb, d_in_pad), lambda i, n: (i, 0)),
        pl.BlockSpec((d_in_pad, tn), lambda i, n: (0, n), **res_kwargs),
        pl.BlockSpec((1, tn), lambda i, n: (0, n), **res_kwargs),
    )
    out_specs = (
        pl.BlockSpec((tb, tn), lambda i, n: (i, n)),
        pl.BlockSpec((8, tn), lambda i, n: (i, n)),
    )
    out_shape = (
        jax.ShapeDtypeStruct((b_pad, d_out_pad), jnp.float32),
        jax.ShapeDtypeStruct((nb * 8, d_out_pad), jnp.float32),
    )
    return pl.pallas_call(
        kernel,
        grid=(nb, nn),
        in_specs=in_specs,
        out_specs=out_specs,
        out_shape=out_shape,
        compiler_params=pltpu.CompilerParams(
            dimension_semantics=("parallel", "parallel"),
            vmem_limit_bytes=int(vmem_limit),
        ),
    )


def neuron_forward(x, params: NeuronParams):
    """x: (B, D_in) f32.  Returns (relu(x_dir @ W^T + b) of shape (B, D_out),
    mean of the pre-activation)."""
    B, D_in = x.shape
    if D_in != params.d_in:
        raise ValueError("x feature dim does not match prepared params")

    w_p, b_p = params.w, params.b
    d_in_pad, d_out_pad = w_p.shape
    tn = params.tn
    nn = d_out_pad // tn
    single = nn == 1

    cap = params.vmem_cap
    budget = int(0.60 * cap)

    # Pipelined VMEM accounting: 2x streamed buffers, 1x resident weight/bias.
    w_buf = (1 if single else 2) * d_in_pad * tn * 2            # bf16 weight
    bias_buf = (1 if single else 2) * tn * 4
    psum_buf = 2 * 8 * tn * 4
    per_row = 2 * (d_in_pad + tn) * 4                           # 2x (x tile + y tile)
    avail = budget - w_buf - bias_buf - psum_buf

    if avail >= per_row * 8:
        tb = min(1024, max(8, (avail // per_row) // 8 * 8))
    else:
        tb = 8
    tb = min(tb, _round_up(B, 8))
    if B >= 64:
        # Keep >= 2 batch tiles so both v7x TensorCores get work ("parallel" axis).
        tb = min(tb, max(8, _round_up(pl.cdiv(B, 2), 8)))
    tb = max(8, tb)

    b_pad = _round_up(B, tb)
    nb = b_pad // tb
    needs_mask = b_pad != B
    rows_in_last = B - (nb - 1) * tb

    # Only pad x when actually needed (avoids an HBM rewrite of the activation).
    pad_rows = b_pad - B
    pad_cols = d_in_pad - D_in
    xf = x.astype(jnp.float32)
    x_p = jnp.pad(xf, ((0, pad_rows), (0, pad_cols))) if (pad_rows or pad_cols) else xf

    need = (w_buf + bias_buf + psum_buf
            + 2 * tb * d_in_pad * 4 + 2 * tb * tn * 4 + (2 << 20))
    vmem_limit = max(8 << 20, min(int(1.25 * need), int(0.90 * cap)))

    kernel = functools.partial(
        _neuron_kernel,
        inv_d_in=1.0 / D_in,
        rows_in_last=rows_in_last,
        needs_mask=needs_mask,
        nb=nb,
    )

    try:
        call = _build_call(kernel, nb, nn, tb, tn, d_in_pad, d_out_pad, b_pad,
                           vmem_limit, single_buffer=single)
        y_pad, psum = call(x_p, w_p, b_p)
    except Exception:
        if not single:
            raise
        # Fallback: default (double-buffered) resident weight/bias.
        call = _build_call(kernel, nb, nn, tb, tn, d_in_pad, d_out_pad, b_pad,
                           vmem_limit, single_buffer=False)
        y_pad, psum = call(x_p, w_p, b_p)

    y = y_pad[:B, :params.d_out]
    # Sublane 0 of each 8-row slab holds that tile's column sums.
    lin_sum = psum.reshape(nb, 8, d_out_pad)[:, 0, :].sum()
    lin_mean = lin_sum / (B * params.d_out)
    return y, lin_mean


if __name__ == "__main__":
    # Small shapes consistent with the module: Neuron.build_params(in_features, out_features).
    B, D_in, D_out = 8, 32, 16

    key = jax.random.PRNGKey(0)
    kx, kw, kb = jax.random.split(key, 3)

    x = jax.random.normal(kx, (B, D_in), dtype=jnp.float32)

    # Deterministic Linear params (PyTorch-style uniform(-1/sqrt(in), 1/sqrt(in))).
    bound = 1.0 / math.sqrt(D_in)
    w = jax.random.uniform(kw, (D_out, D_in), minval=-bound, maxval=bound, dtype=jnp.float32)
    b = jax.random.uniform(kb, (D_out,), minval=-bound, maxval=bound, dtype=jnp.float32)

    # One-time param prep (reused across forward calls).
    params = prepare_neuron_params(w, b)

    y, lin_mean = neuron_forward(x, params)
    jax.block_until_ready(y)
    jax.block_until_ready(lin_mean)

    # --- references ---
    ms = jnp.mean(x * x, axis=-1, keepdims=True)
    x_dir = x / (jnp.sqrt(ms) + 1e-8)

    # (a) Same precision policy as the kernel: bf16 operands, f32 accumulation.
    lin_q = jnp.dot(x_dir.astype(jnp.bfloat16), w.T.astype(jnp.bfloat16),
                    preferred_element_type=jnp.float32) + b
    y_q = jnp.maximum(lin_q, 0.0)
    mean_q = jnp.mean(lin_q)

    # (b) Full-f32 module semantics (tolerance accounts for bf16 operand quantization).
    lin_f = x_dir @ w.T + b
    y_f = jnp.maximum(lin_f, 0.0)
    mean_f = jnp.mean(lin_f)

    assert jnp.allclose(y, y_q, atol=1e-3, rtol=1e-3), "ReLU output mismatch (bf16-policy ref)"
    assert jnp.allclose(lin_mean, mean_q, atol=1e-3, rtol=1e-3), "mean mismatch (bf16-policy ref)"
    assert jnp.allclose(y, y_f, atol=3e-2, rtol=3e-2), "ReLU output mismatch (f32 ref)"
    assert jnp.allclose(lin_mean, mean_f, atol=1e-2, rtol=1e-2), "mean mismatch (f32 ref)"

    print("KERNEL_OK")
</pallas_src>

<mosaic_0001>
module attributes {stable_mosaic.version = 11 : i64} {
  func.func @_neuron_kernel(%arg0: i32, %arg1: i32, %arg2: memref<8x128xf32, #tpu.memory_space<vmem>>, %arg3: memref<128x128xbf16, #tpu.memory_space<vmem>>, %arg4: memref<1x128xf32, #tpu.memory_space<vmem>>, %arg5: memref<8x128xf32, #tpu.memory_space<vmem>>, %arg6: memref<8x128xf32, #tpu.memory_space<vmem>>) attributes {dimension_semantics = [#tpu.dimension_semantics<parallel>, #tpu.dimension_semantics<parallel>], iteration_bounds = array<i64: 1, 1>, scalar_prefetch = 0 : i64, scratch_operands = 0 : i64, tpu.core_type = #tpu.core_type<tc>, window_params = [{transform_indices = @transform_0, window_bounds = array<i64: 8, 128>}, {pipeline_mode = #tpu.pipeline_mode<synchronous>, transform_indices = @transform_1, window_bounds = array<i64: 128, 128>}, {pipeline_mode = #tpu.pipeline_mode<synchronous>, transform_indices = @transform_2, window_bounds = array<i64: 1, 128>}, {transform_indices = @transform_3, window_bounds = array<i64: 8, 128>}, {transform_indices = @transform_4, window_bounds = array<i64: 8, 128>}]} {
    %c0 = arith.constant 0 : index
    %c0_0 = arith.constant 0 : index
    %0 = vector.load %arg2[%c0, %c0_0] : memref<8x128xf32, #tpu.memory_space<vmem>>, vector<8x128xf32>
    %1 = arith.mulf %0, %0 : vector<8x128xf32>
    %cst = arith.constant dense<0.000000e+00> : vector<8xf32>
    %2 = vector.multi_reduction <add>, %1, %cst [1] : vector<8x128xf32> to vector<8xf32>
    %3 = vector.shape_cast %2 : vector<8xf32> to vector<8x1xf32>
    %cst_1 = arith.constant 3.125000e-02 : f32
    %4 = vector.broadcast %cst_1 : f32 to vector<8x1xf32>
    %5 = arith.mulf %3, %4 : vector<8x1xf32>
    %6 = math.sqrt %5 : vector<8x1xf32>
    %cst_2 = arith.constant 9.99999993E-9 : f32
    %7 = vector.broadcast %cst_2 : f32 to vector<8x1xf32>
    %8 = arith.addf %6, %7 : vector<8x1xf32>
    %9 = tpu.reciprocal %8 : vector<8x1xf32> -> vector<8x1xf32>
    %10 = vector.broadcast %9 : vector<8x1xf32> to vector<8x128xf32>
    %11 = arith.mulf %0, %10 : vector<8x128xf32>
    %12 = arith.truncf %11 : vector<8x128xf32> to vector<8x128xbf16>
    %c0_3 = arith.constant 0 : index
    %c0_4 = arith.constant 0 : index
    %13 = vector.load %arg3[%c0_3, %c0_4] : memref<128x128xbf16, #tpu.memory_space<vmem>>, vector<128x128xbf16>
    %cst_5 = arith.constant dense<0.000000e+00> : vector<8x128xf32>
    %14 = tpu.matmul %12, %13, %cst_5 {dimension_numbers = #tpu.dot_dimension_numbers<[1], [0], [0], [1], [0, 0, 1, 1], [], []>} : vector<8x128xbf16>, vector<128x128xbf16>, vector<8x128xf32> -> vector<8x128xf32>
    %c0_6 = arith.constant 0 : index
    %c0_7 = arith.constant 0 : index
    %15 = vector.load %arg4[%c0_6, %c0_7] : memref<1x128xf32, #tpu.memory_space<vmem>>, vector<1x128xf32>
    %16 = vector.broadcast %15 : vector<1x128xf32> to vector<8x128xf32>
    %17 = arith.addf %14, %16 : vector<8x128xf32>
    %cst_8 = arith.constant 0.000000e+00 : f32
    %18 = vector.broadcast %cst_8 : f32 to vector<8x128xf32>
    %19 = arith.maximumf %17, %18 : vector<8x128xf32>
    %c0_9 = arith.constant 0 : index
    %c0_10 = arith.constant 0 : index
    %20 = vector.load %arg5[%c0_9, %c0_10] : memref<8x128xf32, #tpu.memory_space<vmem>>, vector<8x128xf32>
    tpu.vector_store %arg5[%c0_9, %c0_10], %19 {strides = array<i32>} : memref<8x128xf32, #tpu.memory_space<vmem>>, vector<8x128xf32>,
    %cst_11 = arith.constant dense<0.000000e+00> : vector<128xf32>
    %21 = vector.multi_reduction <add>, %17, %cst_11 [0] : vector<8x128xf32> to vector<128xf32>
    %22 = vector.shape_cast %21 : vector<128xf32> to vector<1x128xf32>
    %23 = vector.shape_cast %22 : vector<1x128xf32> to vector<1x128xf32>
    %24 = vector.broadcast %23 : vector<1x128xf32> to vector<8x128xf32>
    %c0_12 = arith.constant 0 : index
    %c0_13 = arith.constant 0 : index
    %25 = vector.load %arg6[%c0_12, %c0_13] : memref<8x128xf32, #tpu.memory_space<vmem>>, vector<8x128xf32>
    tpu.vector_store %arg6[%c0_12, %c0_13], %24 {strides = array<i32>} : memref<8x128xf32, #tpu.memory_space<vmem>>, vector<8x128xf32>,
    return
  }
  func.func @transform_0(%arg0: i32, %arg1: i32) -> (i32, i32) {
    %c0_i32 = arith.constant 0 : i32
    %c0_i32_0 = arith.constant 0 : i32
    return %arg0, %c0_i32 : i32, i32
  }
  func.func @transform_1(%arg0: i32, %arg1: i32) -> (i32, i32) {
    %c0_i32 = arith.constant 0 : i32
    %c0_i32_0 = arith.constant 0 : i32
    return %c0_i32, %arg1 : i32, i32
  }
  func.func @transform_2(%arg0: i32, %arg1: i32) -> (i32, i32) {
    %c0_i32 = arith.constant 0 : i32
    %c0_i32_0 = arith.constant 0 : i32
    return %c0_i32, %arg1 : i32, i32
  }
  func.func @transform_3(%arg0: i32, %arg1: i32) -> (i32, i32) {
    %c0_i32 = arith.constant 0 : i32
    return %arg0, %arg1 : i32, i32
  }
  func.func @transform_4(%arg0: i32, %arg1: i32) -> (i32, i32) {
    %c0_i32 = arith.constant 0 : i32
    return %arg0, %arg1 : i32, i32
  }
}

module attributes {stable_mosaic.version = 11 : i64} {
  func.func @_neuron_kernel(%arg0: i32, %arg1: i32, %arg2: memref<8x128xf32, #tpu.memory_space<vmem>>, %arg3: memref<128x128xbf16, #tpu.memory_space<vmem>>, %arg4: memref<1x128xf32, #tpu.memory_space<vmem>>, %arg5: memref<8x128xf32, #tpu.memory_space<vmem>>, %arg6: memref<8x128xf32, #tpu.memory_space<vmem>>) attributes {dimension_semantics = [#tpu.dimension_semantics<parallel>, #tpu.dimension_semantics<parallel>], iteration_bounds = array<i64: 1, 1>, scalar_prefetch = 0 : i64, scratch_operands = 0 : i64, tpu.core_type = #tpu.core_type<tc>, window_params = [{transform_indices = @transform_0, window_bounds = array<i64: 8, 128>}, {transform_indices = @transform_1, window_bounds = array<i64: 128, 128>}, {transform_indices = @transform_2, window_bounds = array<i64: 1, 128>}, {transform_indices = @transform_3, window_bounds = array<i64: 8, 128>}, {transform_indices = @transform_4, window_bounds = array<i64: 8, 128>}]} {
    %c0 = arith.constant 0 : index
    %c0_0 = arith.constant 0 : index
    %0 = vector.load %arg2[%c0, %c0_0] : memref<8x128xf32, #tpu.memory_space<vmem>>, vector<8x128xf32>
    %1 = arith.mulf %0, %0 : vector<8x128xf32>
    %cst = arith.constant dense<0.000000e+00> : vector<8xf32>
    %2 = vector.multi_reduction <add>, %1, %cst [1] : vector<8x128xf32> to vector<8xf32>
    %3 = vector.shape_cast %2 : vector<8xf32> to vector<8x1xf32>
    %cst_1 = arith.constant 3.125000e-02 : f32
    %4 = vector.broadcast %cst_1 : f32 to vector<8x1xf32>
    %5 = arith.mulf %3, %4 : vector<8x1xf32>
    %6 = math.sqrt %5 : vector<8x1xf32>
    %cst_2 = arith.constant 9.99999993E-9 : f32
    %7 = vector.broadcast %cst_2 : f32 to vector<8x1xf32>
    %8 = arith.addf %6, %7 : vector<8x1xf32>
    %9 = tpu.reciprocal %8 : vector<8x1xf32> -> vector<8x1xf32>
    %10 = vector.broadcast %9 : vector<8x1xf32> to vector<8x128xf32>
    %11 = arith.mulf %0, %10 : vector<8x128xf32>
    %12 = arith.truncf %11 : vector<8x128xf32> to vector<8x128xbf16>
    %c0_3 = arith.constant 0 : index
    %c0_4 = arith.constant 0 : index
    %13 = vector.load %arg3[%c0_3, %c0_4] : memref<128x128xbf16, #tpu.memory_space<vmem>>, vector<128x128xbf16>
    %cst_5 = arith.constant dense<0.000000e+00> : vector<8x128xf32>
    %14 = tpu.matmul %12, %13, %cst_5 {dimension_numbers = #tpu.dot_dimension_numbers<[1], [0], [0], [1], [0, 0, 1, 1], [], []>} : vector<8x128xbf16>, vector<128x128xbf16>, vector<8x128xf32> -> vector<8x128xf32>
    %c0_6 = arith.constant 0 : index
    %c0_7 = arith.constant 0 : index
    %15 = vector.load %arg4[%c0_6, %c0_7] : memref<1x128xf32, #tpu.memory_space<vmem>>, vector<1x128xf32>
    %16 = vector.broadcast %15 : vector<1x128xf32> to vector<8x128xf32>
    %17 = arith.addf %14, %16 : vector<8x128xf32>
    %cst_8 = arith.constant 0.000000e+00 : f32
    %18 = vector.broadcast %cst_8 : f32 to vector<8x128xf32>
    %19 = arith.maximumf %17, %18 : vector<8x128xf32>
    %c0_9 = arith.constant 0 : index
    %c0_10 = arith.constant 0 : index
    %20 = vector.load %arg5[%c0_9, %c0_10] : memref<8x128xf32, #tpu.memory_space<vmem>>, vector<8x128xf32>
    tpu.vector_store %arg5[%c0_9, %c0_10], %19 {strides = array<i32>} : memref<8x128xf32, #tpu.memory_space<vmem>>, vector<8x128xf32>,
    %cst_11 = arith.constant dense<0.000000e+00> : vector<128xf32>
    %21 = vector.multi_reduction <add>, %17, %cst_11 [0] : vector<8x128xf32> to vector<128xf32>
    %22 = vector.shape_cast %21 : vector<128xf32> to vector<1x128xf32>
    %23 = vector.shape_cast %22 : vector<1x128xf32> to vector<1x128xf32>
    %24 = vector.broadcast %23 : vector<1x128xf32> to vector<8x128xf32>
    %c0_12 = arith.constant 0 : index
    %c0_13 = arith.constant 0 : index
    %25 = vector.load %arg6[%c0_12, %c0_13] : memref<8x128xf32, #tpu.memory_space<vmem>>, vector<8x128xf32>
    tpu.vector_store %arg6[%c0_12, %c0_13], %24 {strides = array<i32>} : memref<8x128xf32, #tpu.memory_space<vmem>>, vector<8x128xf32>,
    return
  }
  func.func @transform_0(%arg0: i32, %arg1: i32) -> (i32, i32) {
    %c0_i32 = arith.constant 0 : i32
    %c0_i32_0 = arith.constant 0 : i32
    return %arg0, %c0_i32 : i32, i32
  }
  func.func @transform_1(%arg0: i32, %arg1: i32) -> (i32, i32) {
    %c0_i32 = arith.constant 0 : i32
    %c0_i32_0 = arith.constant 0 : i32
    return %c0_i32, %arg1 : i32, i32
  }
  func.func @transform_2(%arg0: i32, %arg1: i32) -> (i32, i32) {
    %c0_i32 = arith.constant 0 : i32
    %c0_i32_0 = arith.constant 0 : i32
    return %c0_i32, %arg1 : i32, i32
  }
  func.func @transform_3(%arg0: i32, %arg1: i32) -> (i32, i32) {
    %c0_i32 = arith.constant 0 : i32
    return %arg0, %arg1 : i32, i32
  }
  func.func @transform_4(%arg0: i32, %arg1: i32) -> (i32, i32) {
    %c0_i32 = arith.constant 0 : i32
    return %arg0, %arg1 : i32, i32
  }
}

</mosaic_0001>

<bundles_post_ra>
// kernel: tpu_custom_call.1
= control target key start
LH: loop header
LB: loop body
LE: loop exit
PB: predicated region body
PF: predicated region fallthrough
CT: control target
= control target key end

     0   :  { %10 = vsyncpa [#allocation3], 0  ;;  %s405_s0 = inlined_call_operand.hbm [shape: f32[8,128], index: 0, kind: input, shape index: {}]   ;;  %s406_s1 = inlined_call_operand.hbm [shape: bf16[128,128], index: 1, kind: input, shape index: {}]   ;;  %s407_s2 = inlined_call_operand.vmem [shape: f32[1,128], index: 2, kind: input, shape index: {}]   ;;  %s408_s3 = inlined_call_operand.hbm [shape: f32[8,128], index: 3, kind: output, shape index: {0}]   ;;  %s409_s4 = inlined_call_operand.hbm [shape: f32[8,128], index: 4, kind: output, shape index: {1}]  }
   0x1   :  { %11 = vsyncpa [#allocation6], 0 }
   0x2   :  { %12 = vsyncpa [#allocation4], 0 }
   0x3   :  { %13 = vsyncpa [#allocation9], 0  ;;  %s357_s15 = smov [#allocation2]   ;;  %s358_s17 = smov [#allocation5]  }
   0x4   :  { %s20_s16 = sshll.u32 %s357_s15, 4  ;;  %s29_s18 = sshll.u32 %s358_s17, 4  ;;  %s21_s16 = int_to_ptr.vmem [resolvable:$true] %s20_s16  ;;  %s30_s18 = int_to_ptr.vmem [resolvable:$true] %s29_s18 }
   0x5   :  { %s277_s19 = scalar_lea.vmem %s21_s16, 128  ;;  %p282_p1 = scmp.lt.s32.totalorder %s21_s16, %s21_s16 }
   0x6   :  { %p278_p0 = scmp.ne.s32.totalorder %s21_s16, %s277_s19  ;;  %p283_p2 = scmp.lt.s32.totalorder %s277_s19, %s277_s19 }
   0x8   :  { %p284_p3 = por %p283_p2, %p282_p1 }
   0xa   :  { %p285_p4 = pnand %p284_p3, %p278_p0 }
   0xc   :  { %288 = shalt.err (!%p285_p4)
}
   0xd   :  { %23 = dma.hbm_to_vmem [thread:$0]  %s405_s0, 128, %s21_s16, [#allocation3]  }
   0xe   :  { %s297_s22 = scalar_lea.vmem %s30_s18, 1024  ;;  %p302_p6 = scmp.lt.s32.totalorder %s30_s18, %s30_s18 }
   0xf   :  { %p298_p5 = scmp.ne.s32.totalorder %s30_s18, %s297_s22  ;;  %p303_p7 = scmp.lt.s32.totalorder %s297_s22, %s297_s22 }
  0x11   :  { %p304_p8 = por %p303_p7, %p302_p6 }
  0x13   :  { %p305_p9 = pnand %p304_p8, %p298_p5 }
  0x15   :  { %308 = shalt.err (!%p305_p9)
}
  0x16   :  { %s359_s23 = smov 64   ;;  %s360_s24 = smov 4  }
  0x17   :  { %35 = dma.hbm_to_vmem [thread:$0]  %s406_s1, 1024, %s30_s18, [#allocation6], %s359_s23, %s359_s23, %s360_s24  }
  0x18   :  { %349 = dma.done.wait [#allocation3], 128  }
  0x19   :  { %350 = vsyncadd [#allocation3], 4294967168 }
  0x1a   :  { %351 = dma.done.wait [#allocation6], 1024  }
  0x1b   :  { %352 = vsyncadd [#allocation6], 4294966272  ;;  %v45_v0 = vld [vmem:[#allocation2] sm:$0xff]  ;;  %v361_v3 = vmov 0.0   ;;  %v258_v4 = vld [vmem:[#allocation5 + $0x30] sm:$0xff]   ;;  %vm362_vm0 = vmmov 0  }
  0x1c   :  { %v46_v1 = vmul.f32 %v45_v0, %v45_v0  ;;  %v257_v2 = vld [vmem:[#allocation5 + $0x38] sm:$0xff]   ;;  %229 = vmatprep.subr.bf16.mxu0 %v361_v3  ;;  %v259_v5 = vld [vmem:[#allocation5 + $0x28] sm:$0xff]   ;;  %v260_v6 = vld [vmem:[#allocation5 + $0x20] sm:$0xff]   ;;  %245 = vmatprep.mubr.msk.bf16.mxu0 %vm362_vm0, %v361_v3  ;;  %s363_s27 = smov [#allocation7]  }
  0x1d   :  { %230 = vmatpush3.bf16.msra.mxu0 %v257_v2  ;;  %v261_v7 = vld [vmem:[#allocation5 + $0x18] sm:$0xff]   ;;  %v262_v8 = vld [vmem:[#allocation5 + $0x10] sm:$0xff]   ;;  %v263_v9 = vld [vmem:[#allocation5 + $0x8] sm:$0xff]   ;;  %s187_s28 = sshll.u32 %s363_s27, 4  ;;  %s188_s28 = int_to_ptr.vmem [resolvable:$true] %s187_s28 }
  0x1e   :  { %47 = vadd.xlane.f32.xlu0 %v46_v1  ;;  %231 = vmatprep.subr.bf16.mxu0 %v361_v3  ;;  %v264_v10 = vld [vmem:[#allocation5] sm:$0xff]   ;;  %v211_v22 = vld [vmem:[%s407_s2] ss:$0 sm:$0xff]  ;;  %s309_s29 = scalar_lea.vmem %s188_s28, 128  ;;  %p314_p11 = scmp.lt.s32.totalorder %s188_s28, %s188_s28 }
  0x1f   :  { %p310_p10 = scmp.ne.s32.totalorder %s188_s28, %s309_s29  ;;  %p315_p12 = scmp.lt.s32.totalorder %s309_s29, %s309_s29 }
  0x21   :  { %232 = vmatpush3.bf16.msra.mxu0 %v258_v4  ;;  %p316_p13 = por %p315_p12, %p314_p11 }
  0x22   :  { %233 = vmatprep.subr.bf16.mxu0 %v361_v3 }
  0x23   :  { %p317_p0 = pnand %p316_p13, %p310_p10 }
  0x25   :  { %234 = vmatpush3.bf16.msra.mxu0 %v259_v5 }
  0x26   :  { %235 = vmatprep.subr.bf16.mxu0 %v361_v3 }
  0x29   :  { %236 = vmatpush3.bf16.msra.mxu0 %v260_v6 }
  0x2a   :  { %237 = vmatprep.subr.bf16.mxu0 %v361_v3 }
  0x2d   :  { %238 = vmatpush3.bf16.msra.mxu0 %v261_v7 }
  0x2e   :  { %239 = vmatprep.subr.bf16.mxu0 %v361_v3 }
  0x31   :  { %240 = vmatpush3.bf16.msra.mxu0 %v262_v8 }
  0x32   :  { %241 = vmatprep.subr.bf16.mxu0 %v361_v3 }
  0x35   :  { %242 = vmatpush3.bf16.msra.mxu0 %v263_v9 }
  0x36   :  { %243 = vmatprep.subr.bf16.mxu0 %v361_v3 }
  0x39   :  { %244 = vmatpush3.bf16.msra.mxu0 %v264_v10 }
  0xa7   :  { %v48_v11 = vpop.xlane.xlu0 %47 }
  0xa8   :  { %v49_v12 = vmul.f32 0.03125, %v48_v11 }
  0xaa   :  { %265 = vrsqrt.f32 %v49_v12  ;;  %vm52_vm1 = vcmp.eq.f32.partialorder %v49_v12, inf  ;;  %v55_v15 = vand.u32 2147483648, %v49_v12  ;;  %vm54_vm2 = vcmp.eq.f32.partialorder %v49_v12, 0.0 }
  0xb7   :  { %v266_v13 = vpop.eup %265 }
  0xb8   :  { %v51_v14 = vmul.f32 %v266_v13, %v49_v12 }
  0xba   :  { %v53_v16 = vsel %vm52_vm1, %v49_v12, %v51_v14 }
  0xbb   :  { %v56_v17 = vsel %vm54_vm2, %v55_v15, %v53_v16 }
  0xbc   :  { %v57_v18 = vadd.f32 1e-08, %v56_v17 }
  0xbe   :  { %267 = vrcp.f32 %v57_v18 }
  0xcb   :  { %v268_v19 = vpop.eup %267 }
  0xcc   :  { %v59_v20 = vmul.f32 %v268_v19, %v45_v0 }
  0xce   :  { %v60_v21 = vpack.c.bf16 %v59_v20, %v59_v20 }
  0xd0   :  { %246 = vmatmul.mubr.bf16.vlgmr.msra.gmra.mxu0 %v60_v21 }
 0x190   :  { %v166_v23 = vpop.f32.mrf.mxu0 }
 0x191   :  { %v167_v24 = vadd.f32 %v211_v22, %v166_v23 }
 0x192   :  { %v247_v25 = vpop.f32.mrf.mxu0 }
 0x193   :  { %v174_v26 = vrot.slane %v167_v24, 4  ;;  %v172_v27 = vmax.f32 %v167_v24, 0.0 }
 0x194   :  { %v169_v28 = vpop.f32.mrf.mxu0 }
 0x195   :  { %v175_v29 = vadd.f32 %v174_v26, %v167_v24  ;;  %173 = vst [vmem:[#allocation7] sm:$0xff] %v172_v27 }
 0x196   :  { %v248_v30 = vpop.f32.mrf.mxu0 }
 0x197   :  { %320 = shalt.err (!%p317_p0)
}
 0x198   :  { %190 = dma.vmem_to_hbm [thread:$0]  %s188_s28, 128, %s408_s3, [#allocation4]   ;;  %v176_v31 = vrot.slane %v175_v29, 2 }
 0x199   :  { %s364_s5 = smov [#allocation8]  }
 0x19a   :  { %v177_v32 = vadd.f32 %v176_v31, %v175_v29  ;;  %s197_s6 = sshll.u32 %s364_s5, 4  ;;  %s198_s6 = int_to_ptr.vmem [resolvable:$true] %s197_s6 }
 0x19b   :  { %s329_s7 = scalar_lea.vmem %s198_s6, 128  ;;  %p334_p2 = scmp.lt.s32.totalorder %s198_s6, %s198_s6 }
 0x19c   :  { %v178_v33 = vrot.slane %v177_v32, 1  ;;  %p330_p1 = scmp.ne.s32.totalorder %s198_s6, %s329_s7  ;;  %p335_p3 = scmp.lt.s32.totalorder %s329_s7, %s329_s7 }
 0x19e   :  { %v179_v34 = vadd.f32 %v178_v33, %v177_v32  ;;  %p336_p4 = por %p335_p3, %p334_p2 }
 0x1a0   :  { %180 = vst [vmem:[#allocation8] sm:$0xff] %v179_v34  ;;  %p337_p5 = pnand %p336_p4, %p330_p1 }
 0x1a2   :  { %340 = shalt.err (!%p337_p5)
}
 0x1a3   :  { %200 = dma.vmem_to_hbm [thread:$0]  %s198_s6, 128, %s409_s4, [#allocation9]  }
 0x1a4   :  { %353 = dma.done.wait [#allocation4], 128  }
 0x1a5   :  { %354 = vsyncadd [#allocation4], 4294967168 }
 0x1a6   :  { %355 = dma.done.wait [#allocation9], 128  }
 0x1a7   :  { %356 = vsyncadd [#allocation9], 4294967168 }
 0x1a8   :  { %207 = vsyncpa [#allocation3], 1 }
 0x1a9   :  { %208 = vsyncpa [#allocation6], 1 }
 0x1aa   :  { %209 = vsyncpa [#allocation4], 1 }
 0x1ab   :  { %210 = vsyncpa [#allocation9], 1 }

// kernel: tpu_custom_call.1
= control target key start
LH: loop header
LB: loop body
LE: loop exit
PB: predicated region body
PF: predicated region fallthrough
CT: control target
= control target key end

     0   :  { %10 = vsyncpa [#allocation3], 0  ;;  %s405_s0 = inlined_call_operand.hbm [shape: f32[8,128], index: 0, kind: input, shape index: {}]   ;;  %s406_s1 = inlined_call_operand.hbm [shape: bf16[128,128], index: 1, kind: input, shape index: {}]   ;;  %s407_s2 = inlined_call_operand.vmem [shape: f32[1,128], index: 2, kind: input, shape index: {}]   ;;  %s408_s3 = inlined_call_operand.hbm [shape: f32[8,128], index: 3, kind: output, shape index: {0}]   ;;  %s409_s4 = inlined_call_operand.hbm [shape: f32[8,128], index: 4, kind: output, shape index: {1}]  }
   0x1   :  { %11 = vsyncpa [#allocation6], 0 }
   0x2   :  { %12 = vsyncpa [#allocation4], 0 }
   0x3   :  { %13 = vsyncpa [#allocation9], 0  ;;  %s357_s15 = smov [#allocation2]   ;;  %s358_s17 = smov [#allocation5]  }
   0x4   :  { %s20_s16 = sshll.u32 %s357_s15, 4  ;;  %s29_s18 = sshll.u32 %s358_s17, 4  ;;  %s21_s16 = int_to_ptr.vmem [resolvable:$true] %s20_s16  ;;  %s30_s18 = int_to_ptr.vmem [resolvable:$true] %s29_s18 }
   0x5   :  { %s277_s19 = scalar_lea.vmem %s21_s16, 128  ;;  %p282_p1 = scmp.lt.s32.totalorder %s21_s16, %s21_s16 }
   0x6   :  { %p278_p0 = scmp.ne.s32.totalorder %s21_s16, %s277_s19  ;;  %p283_p2 = scmp.lt.s32.totalorder %s277_s19, %s277_s19 }
   0x8   :  { %p284_p3 = por %p283_p2, %p282_p1 }
   0xa   :  { %p285_p4 = pnand %p284_p3, %p278_p0 }
   0xc   :  { %288 = shalt.err (!%p285_p4)
}
   0xd   :  { %23 = dma.hbm_to_vmem [thread:$0]  %s405_s0, 128, %s21_s16, [#allocation3]  }
   0xe   :  { %s297_s22 = scalar_lea.vmem %s30_s18, 1024  ;;  %p302_p6 = scmp.lt.s32.totalorder %s30_s18, %s30_s18 }
   0xf   :  { %p298_p5 = scmp.ne.s32.totalorder %s30_s18, %s297_s22  ;;  %p303_p7 = scmp.lt.s32.totalorder %s297_s22, %s297_s22 }
  0x11   :  { %p304_p8 = por %p303_p7, %p302_p6 }
  0x13   :  { %p305_p9 = pnand %p304_p8, %p298_p5 }
  0x15   :  { %308 = shalt.err (!%p305_p9)
}
  0x16   :  { %s359_s23 = smov 64   ;;  %s360_s24 = smov 4  }
  0x17   :  { %35 = dma.hbm_to_vmem [thread:$0]  %s406_s1, 1024, %s30_s18, [#allocation6], %s359_s23, %s359_s23, %s360_s24  }
  0x18   :  { %349 = dma.done.wait [#allocation3], 128  }
  0x19   :  { %350 = vsyncadd [#allocation3], 4294967168 }
  0x1a   :  { %351 = dma.done.wait [#allocation6], 1024  }
  0x1b   :  { %352 = vsyncadd [#allocation6], 4294966272  ;;  %v45_v0 = vld [vmem:[#allocation2] sm:$0xff]  ;;  %v361_v3 = vmov 0.0   ;;  %v258_v4 = vld [vmem:[#allocation5 + $0x30] sm:$0xff]   ;;  %vm362_vm0 = vmmov 0  }
  0x1c   :  { %v46_v1 = vmul.f32 %v45_v0, %v45_v0  ;;  %v257_v2 = vld [vmem:[#allocation5 + $0x38] sm:$0xff]   ;;  %229 = vmatprep.subr.bf16.mxu0 %v361_v3  ;;  %v259_v5 = vld [vmem:[#allocation5 + $0x28] sm:$0xff]   ;;  %v260_v6 = vld [vmem:[#allocation5 + $0x20] sm:$0xff]   ;;  %245 = vmatprep.mubr.msk.bf16.mxu0 %vm362_vm0, %v361_v3  ;;  %s363_s27 = smov [#allocation7]  }
  0x1d   :  { %230 = vmatpush3.bf16.msra.mxu0 %v257_v2  ;;  %v261_v7 = vld [vmem:[#allocation5 + $0x18] sm:$0xff]   ;;  %v262_v8 = vld [vmem:[#allocation5 + $0x10] sm:$0xff]   ;;  %v263_v9 = vld [vmem:[#allocation5 + $0x8] sm:$0xff]   ;;  %s187_s28 = sshll.u32 %s363_s27, 4  ;;  %s188_s28 = int_to_ptr.vmem [resolvable:$true] %s187_s28 }
  0x1e   :  { %47 = vadd.xlane.f32.xlu0 %v46_v1  ;;  %231 = vmatprep.subr.bf16.mxu0 %v361_v3  ;;  %v264_v10 = vld [vmem:[#allocation5] sm:$0xff]   ;;  %v211_v22 = vld [vmem:[%s407_s2] ss:$0 sm:$0xff]  ;;  %s309_s29 = scalar_lea.vmem %s188_s28, 128  ;;  %p314_p11 = scmp.lt.s32.totalorder %s188_s28, %s188_s28 }
  0x1f   :  { %p310_p10 = scmp.ne.s32.totalorder %s188_s28, %s309_s29  ;;  %p315_p12 = scmp.lt.s32.totalorder %s309_s29, %s309_s29 }
  0x21   :  { %232 = vmatpush3.bf16.msra.mxu0 %v258_v4  ;;  %p316_p13 = por %p315_p12, %p314_p11 }
  0x22   :  { %233 = vmatprep.subr.bf16.mxu0 %v361_v3 }
  0x23   :  { %p317_p0 = pnand %p316_p13, %p310_p10 }
  0x25   :  { %234 = vmatpush3.bf16.msra.mxu0 %v259_v5 }
  0x26   :  { %235 = vmatprep.subr.bf16.mxu0 %v361_v3 }
  0x29   :  { %236 = vmatpush3.bf16.msra.mxu0 %v260_v6 }
  0x2a   :  { %237 = vmatprep.subr.bf16.mxu0 %v361_v3 }
  0x2d   :  { %238 = vmatpush3.bf16.msra.mxu0 %v261_v7 }
  0x2e   :  { %239 = vmatprep.subr.bf16.mxu0 %v361_v3 }
  0x31   :  { %240 = vmatpush3.bf16.msra.mxu0 %v262_v8 }
  0x32   :  { %241 = vmatprep.subr.bf16.mxu0 %v361_v3 }
  0x35   :  { %242 = vmatpush3.bf16.msra.mxu0 %v263_v9 }
  0x36   :  { %243 = vmatprep.subr.bf16.mxu0 %v361_v3 }
  0x39   :  { %244 = vmatpush3.bf16.msra.mxu0 %v264_v10 }
  0xa7   :  { %v48_v11 = vpop.xlane.xlu0 %47 }
  0xa8   :  { %v49_v12 = vmul.f32 0.03125, %v48_v11 }
  0xaa   :  { %265 = vrsqrt.f32 %v49_v12  ;;  %vm52_vm1 = vcmp.eq.f32.partialorder %v49_v12, inf  ;;  %v55_v15 = vand.u32 2147483648, %v49_v12  ;;  %vm54_vm2 = vcmp.eq.f32.partialorder %v49_v12, 0.0 }
  0xb7   :  { %v266_v13 = vpop.eup %265 }
  0xb8   :  { %v51_v14 = vmul.f32 %v266_v13, %v49_v12 }
  0xba   :  { %v53_v16 = vsel %vm52_vm1, %v49_v12, %v51_v14 }
  0xbb   :  { %v56_v17 = vsel %vm54_vm2, %v55_v15, %v53_v16 }
  0xbc   :  { %v57_v18 = vadd.f32 1e-08, %v56_v17 }
  0xbe   :  { %267 = vrcp.f32 %v57_v18 }
  0xcb   :  { %v268_v19 = vpop.eup %267 }
  0xcc   :  { %v59_v20 = vmul.f32 %v268_v19, %v45_v0 }
  0xce   :  { %v60_v21 = vpack.c.bf16 %v59_v20, %v59_v20 }
  0xd0   :  { %246 = vmatmul.mubr.bf16.vlgmr.msra.gmra.mxu0 %v60_v21 }
 0x190   :  { %v166_v23 = vpop.f32.mrf.mxu0 }
 0x191   :  { %v167_v24 = vadd.f32 %v211_v22, %v166_v23 }
 0x192   :  { %v247_v25 = vpop.f32.mrf.mxu0 }
 0x193   :  { %v174_v26 = vrot.slane %v167_v24, 4  ;;  %v172_v27 = vmax.f32 %v167_v24, 0.0 }
 0x194   :  { %v169_v28 = vpop.f32.mrf.mxu0 }
 0x195   :  { %v175_v29 = vadd.f32 %v174_v26, %v167_v24  ;;  %173 = vst [vmem:[#allocation7] sm:$0xff] %v172_v27 }
 0x196   :  { %v248_v30 = vpop.f32.mrf.mxu0 }
 0x197   :  { %320 = shalt.err (!%p317_p0)
}
 0x198   :  { %190 = dma.vmem_to_hbm [thread:$0]  %s188_s28, 128, %s408_s3, [#allocation4]   ;;  %v176_v31 = vrot.slane %v175_v29, 2 }
 0x199   :  { %s364_s5 = smov [#allocation8]  }
 0x19a   :  { %v177_v32 = vadd.f32 %v176_v31, %v175_v29  ;;  %s197_s6 = sshll.u32 %s364_s5, 4  ;;  %s198_s6 = int_to_ptr.vmem [resolvable:$true] %s197_s6 }
 0x19b   :  { %s329_s7 = scalar_lea.vmem %s198_s6, 128  ;;  %p334_p2 = scmp.lt.s32.totalorder %s198_s6, %s198_s6 }
 0x19c   :  { %v178_v33 = vrot.slane %v177_v32, 1  ;;  %p330_p1 = scmp.ne.s32.totalorder %s198_s6, %s329_s7  ;;  %p335_p3 = scmp.lt.s32.totalorder %s329_s7, %s329_s7 }
 0x19e   :  { %v179_v34 = vadd.f32 %v178_v33, %v177_v32  ;;  %p336_p4 = por %p335_p3, %p334_p2 }
 0x1a0   :  { %180 = vst [vmem:[#allocation8] sm:$0xff] %v179_v34  ;;  %p337_p5 = pnand %p336_p4, %p330_p1 }
 0x1a2   :  { %340 = shalt.err (!%p337_p5)
}
 0x1a3   :  { %200 = dma.vmem_to_hbm [thread:$0]  %s198_s6, 128, %s409_s4, [#allocation9]  }
 0x1a4   :  { %353 = dma.done.wait [#allocation4], 128  }
 0x1a5   :  { %354 = vsyncadd [#allocation4], 4294967168 }
 0x1a6   :  { %355 = dma.done.wait [#allocation9], 128  }
 0x1a7   :  { %356 = vsyncadd [#allocation9], 4294967168 }
 0x1a8   :  { %207 = vsyncpa [#allocation3], 1 }
 0x1a9   :  { %208 = vsyncpa [#allocation6], 1 }
 0x1aa   :  { %209 = vsyncpa [#allocation4], 1 }
 0x1ab   :  { %210 = vsyncpa [#allocation9], 1 }

</bundles_post_ra>
